<compile_context>
chip_gen: v7x
topology: tpu7x:2x2x1
jax: 0.10.0
libtpu: 0.0.40
codegen_flags: <defaults>
</compile_context>

<pallas_src>
import jax
import jax.numpy as jnp
from jax import lax
from jax.experimental import pallas as pl
from jax.experimental.pallas import tpu as pltpu

EPS = 1e-12


# ----------------------------------------------------------------------------
# Fused kernel: spectral norm of the (Cout, Cin*kh*kw) weight + conv-as-matmul.
# Everything fits in VMEM; single program, no grid.
# ----------------------------------------------------------------------------
def _fused_sn_conv_kernel(w_ref, u_ref, bias_ref, p_ref,
                          out_ref, u_new_ref, wsn_ref):
    w = w_ref[...]                       # (Cout, K)  f32, K = Cin*kh*kw
    u = u_ref[...]                       # (1, Cout)  f32

    # --- one power iteration (MXU matvecs, exact l2normalize semantics) -----
    wtu = jnp.dot(u, w, preferred_element_type=jnp.float32)          # (1, K)
    v = wtu / (jnp.sqrt(jnp.sum(wtu * wtu)) + EPS)                    # (1, K)

    # W @ v as a transposed contraction (no explicit .T needed)
    wv = lax.dot_general(w, v, (((1,), (1,)), ((), ())),
                         preferred_element_type=jnp.float32)          # (Cout, 1)
    u_new = wv / (jnp.sqrt(jnp.sum(wv * wv)) + EPS)                   # (Cout, 1)

    # sigma = u_new . (W v).  NOTE: no guard against sigma ~ 0 (matches PyTorch).
    sigma = jnp.sum(u_new * wv)
    w_sn = w / sigma                                                  # (Cout, K)

    u_new_ref[...] = u_new
    wsn_ref[...] = w_sn

    # --- conv as matmul: per-batch (Cout, K) @ (K, H*W) — lane-dense output --
    bias = bias_ref[...]                                              # (Cout, 1)
    n_batch = p_ref.shape[0]
    for n in range(n_batch):             # static unroll over the tiny batch
        out_ref[n] = (jnp.dot(w_sn, p_ref[n],
                              preferred_element_type=jnp.float32)
                      + bias).astype(out_ref.dtype)


# ----------------------------------------------------------------------------
# Glue: transpose-free im2col for a 3x3 / stride 1 / pad 1 conv, NCHW input.
# Returns (N, Cin*9, H*W) with K index = c*9 + kh*3 + kw, matching the
# flattening of an OIHW weight into (Cout, Cin*9).
# ----------------------------------------------------------------------------
def im2col_t_3x3_same(x):
    # TODO(synk): at production conv sizes move this into the kernel (DMA the
    # padded input and build the 9 shifted views in VMEM) to kill the 9x HBM
    # expansion; at this tiny size XLA pad+slice+stack is negligible.
    N, C, H, W = x.shape
    xp = jnp.pad(x, ((0, 0), (0, 0), (1, 1), (1, 1)))
    cols = [xp[:, :, i:i + H, j:j + W] for i in range(3) for j in range(3)]
    p = jnp.stack(cols, axis=2)                     # (N, C, 9, H, W)
    return p.reshape(N, C * 9, H * W)               # contiguous reshape only


def spectral_norm_conv_forward(x, w_bar, bias, u):
    """Forward of SpectralNorm(Conv2d(Cin, Cout, 3, padding=1)).  x: NCHW.

    Returns (y_NCHW, W_SN in OIHW, updated u).
    """
    N, Cin, H, W = x.shape
    Cout = w_bar.shape[0]
    K = Cin * 3 * 3
    HW = H * W

    w2d = w_bar.reshape(Cout, K).astype(jnp.float32)
    u2 = u.reshape(1, Cout).astype(jnp.float32)
    b2 = bias.reshape(Cout, 1).astype(jnp.float32)
    patches = im2col_t_3x3_same(x.astype(jnp.float32))        # (N, K, HW)

    out_chw, u_new, w_sn2d = pl.pallas_call(
        _fused_sn_conv_kernel,
        out_shape=(
            jax.ShapeDtypeStruct((N, Cout, HW), jnp.float32),  # lane-dense out
            jax.ShapeDtypeStruct((Cout, 1), jnp.float32),      # updated u
            jax.ShapeDtypeStruct((Cout, K), jnp.float32),      # W_SN (flat)
        ),
        in_specs=[
            pl.BlockSpec(memory_space=pltpu.MemorySpace.VMEM),
            pl.BlockSpec(memory_space=pltpu.MemorySpace.VMEM),
            pl.BlockSpec(memory_space=pltpu.MemorySpace.VMEM),
            pl.BlockSpec(memory_space=pltpu.MemorySpace.VMEM),
        ],
        out_specs=(
            pl.BlockSpec(memory_space=pltpu.MemorySpace.VMEM),
            pl.BlockSpec(memory_space=pltpu.MemorySpace.VMEM),
            pl.BlockSpec(memory_space=pltpu.MemorySpace.VMEM),
        ),
    )(w2d, u2, b2, patches)

    out = out_chw.reshape(N, Cout, H, W)            # pure reshape, no transpose
    return out, w_sn2d.reshape(w_bar.shape), u_new.reshape(Cout)


if __name__ == "__main__":
    key = jax.random.PRNGKey(0)
    k_w, k_b, k_u, k_v, k_x = jax.random.split(key, 5)

    N, Cin, H, W, Cout, ksz = 2, 4, 16, 16, 8, 3
    height, width = Cout, Cin * ksz * ksz

    # deterministic parameter init (mirrors _make_params)
    w_bar = jax.random.normal(k_w, (Cout, Cin, ksz, ksz), jnp.float32) * 0.1
    bias = jax.random.normal(k_b, (Cout,), jnp.float32) * 0.1
    u0 = jax.random.normal(k_u, (height,), jnp.float32)
    v0 = jax.random.normal(k_v, (width,), jnp.float32)
    u0 = u0 / (jnp.linalg.norm(u0) + EPS)
    v0 = v0 / (jnp.linalg.norm(v0) + EPS)   # v is stored but unused in forward

    x = jax.random.normal(k_x, (N, Cin, H, W), jnp.float32)

    out, w_sn, u_new = spectral_norm_conv_forward(x, w_bar, bias, u0)
    out = jax.block_until_ready(out)

    # pure-JAX reference for validation
    w2d = w_bar.reshape(height, width)
    v_ref = w2d.T @ u0
    v_ref = v_ref / (jnp.linalg.norm(v_ref) + EPS)
    u_ref = w2d @ v_ref
    u_ref = u_ref / (jnp.linalg.norm(u_ref) + EPS)
    sigma = u_ref @ (w2d @ v_ref)
    w_sn_ref = (w2d / sigma).reshape(w_bar.shape)
    out_ref = lax.conv_general_dilated(
        x, w_sn_ref, window_strides=(1, 1), padding="SAME",
        dimension_numbers=("NCHW", "OIHW", "NCHW"),
    ) + bias.reshape(1, Cout, 1, 1)

    assert jnp.allclose(w_sn, w_sn_ref, atol=1e-5), "spectral norm mismatch"
    assert jnp.allclose(u_new, u_ref, atol=1e-5), "u update mismatch"
    assert jnp.allclose(out, out_ref, atol=1e-4, rtol=1e-4), "conv mismatch"
    print("KERNEL_OK")
</pallas_src>

<mosaic_0001>
module attributes {stable_mosaic.version = 11 : i64} {
  func.func @_fused_sn_conv_kernel(%arg0: memref<8x36xf32, #tpu.memory_space<vmem>>, %arg1: memref<1x8xf32, #tpu.memory_space<vmem>>, %arg2: memref<8x1xf32, #tpu.memory_space<vmem>>, %arg3: memref<2x36x256xf32, #tpu.memory_space<vmem>>, %arg4: memref<2x8x256xf32, #tpu.memory_space<vmem>>, %arg5: memref<8x1xf32, #tpu.memory_space<vmem>>, %arg6: memref<8x36xf32, #tpu.memory_space<vmem>>) attributes {dimension_semantics = [], scalar_prefetch = 0 : i64, scratch_operands = 0 : i64, tpu.core_type = #tpu.core_type<tc>} {
    %c0 = arith.constant 0 : index
    %c0_0 = arith.constant 0 : index
    %0 = vector.load %arg0[%c0, %c0_0] : memref<8x36xf32, #tpu.memory_space<vmem>>, vector<8x36xf32>
    %c0_1 = arith.constant 0 : index
    %c0_2 = arith.constant 0 : index
    %1 = vector.load %arg1[%c0_1, %c0_2] : memref<1x8xf32, #tpu.memory_space<vmem>>, vector<1x8xf32>
    %cst = arith.constant dense<0.000000e+00> : vector<1x36xf32>
    %2 = tpu.matmul %1, %0, %cst {dimension_numbers = #tpu.dot_dimension_numbers<[1], [0], [0], [1], [0, 0, 1, 1], [], []>} : vector<1x8xf32>, vector<8x36xf32>, vector<1x36xf32> -> vector<1x36xf32>
    %3 = arith.mulf %2, %2 : vector<1x36xf32>
    %4 = vector.shape_cast %3 : vector<1x36xf32> to vector<1x1x36xf32>
    %cst_3 = arith.constant dense<0.000000e+00> : vector<1xf32>
    %5 = vector.multi_reduction <add>, %4, %cst_3 [1, 2] : vector<1x1x36xf32> to vector<1xf32>
    %6 = vector.shape_cast %5 : vector<1xf32> to vector<1x1x1xf32>
    %7 = vector.extract %6[0, 0, 0] : f32 from vector<1x1x1xf32>
    %8 = math.sqrt %7 : f32
    %cst_4 = arith.constant 9.99999996E-13 : f32
    %9 = arith.addf %8, %cst_4 : f32
    %10 = vector.broadcast %9 : f32 to vector<1x36xf32>
    %11 = arith.divf %2, %10 : vector<1x36xf32>
    %cst_5 = arith.constant dense<0.000000e+00> : vector<8x1xf32>
    %12 = tpu.matmul %0, %11, %cst_5 {dimension_numbers = #tpu.dot_dimension_numbers<[1], [1], [0], [0], [0, 0, 1, 0], [], []>} : vector<8x36xf32>, vector<1x36xf32>, vector<8x1xf32> -> vector<8x1xf32>
    %13 = arith.mulf %12, %12 : vector<8x1xf32>
    %14 = vector.shape_cast %13 : vector<8x1xf32> to vector<1x8x1xf32>
    %cst_6 = arith.constant dense<0.000000e+00> : vector<1xf32>
    %15 = vector.multi_reduction <add>, %14, %cst_6 [1, 2] : vector<1x8x1xf32> to vector<1xf32>
    %16 = vector.shape_cast %15 : vector<1xf32> to vector<1x1x1xf32>
    %17 = vector.extract %16[0, 0, 0] : f32 from vector<1x1x1xf32>
    %18 = math.sqrt %17 : f32
    %cst_7 = arith.constant 9.99999996E-13 : f32
    %19 = arith.addf %18, %cst_7 : f32
    %20 = vector.broadcast %19 : f32 to vector<8x1xf32>
    %21 = arith.divf %12, %20 : vector<8x1xf32>
    %22 = arith.mulf %21, %12 : vector<8x1xf32>
    %23 = vector.shape_cast %22 : vector<8x1xf32> to vector<1x8x1xf32>
    %cst_8 = arith.constant dense<0.000000e+00> : vector<1xf32>
    %24 = vector.multi_reduction <add>, %23, %cst_8 [1, 2] : vector<1x8x1xf32> to vector<1xf32>
    %25 = vector.shape_cast %24 : vector<1xf32> to vector<1x1x1xf32>
    %26 = vector.extract %25[0, 0, 0] : f32 from vector<1x1x1xf32>
    %27 = vector.broadcast %26 : f32 to vector<8x36xf32>
    %28 = arith.divf %0, %27 : vector<8x36xf32>
    %c0_9 = arith.constant 0 : index
    %c0_10 = arith.constant 0 : index
    %29 = vector.load %arg5[%c0_9, %c0_10] : memref<8x1xf32, #tpu.memory_space<vmem>>, vector<8x1xf32>
    tpu.vector_store %arg5[%c0_9, %c0_10], %21 {strides = array<i32>} : memref<8x1xf32, #tpu.memory_space<vmem>>, vector<8x1xf32>,
    %c0_11 = arith.constant 0 : index
    %c0_12 = arith.constant 0 : index
    %30 = vector.load %arg6[%c0_11, %c0_12] : memref<8x36xf32, #tpu.memory_space<vmem>>, vector<8x36xf32>
    tpu.vector_store %arg6[%c0_11, %c0_12], %28 {strides = array<i32>} : memref<8x36xf32, #tpu.memory_space<vmem>>, vector<8x36xf32>,
    %c0_13 = arith.constant 0 : index
    %c0_14 = arith.constant 0 : index
    %31 = vector.load %arg2[%c0_13, %c0_14] : memref<8x1xf32, #tpu.memory_space<vmem>>, vector<8x1xf32>
    %c0_15 = arith.constant 0 : index
    %c0_16 = arith.constant 0 : index
    %c0_17 = arith.constant 0 : index
    %32 = vector.load %arg3[%c0_15, %c0_16, %c0_17] : memref<2x36x256xf32, #tpu.memory_space<vmem>>, vector<1x36x256xf32>
    %33 = vector.shape_cast %32 : vector<1x36x256xf32> to vector<36x256xf32>
    %cst_18 = arith.constant dense<0.000000e+00> : vector<8x256xf32>
    %34 = tpu.matmul %28, %33, %cst_18 {dimension_numbers = #tpu.dot_dimension_numbers<[1], [0], [0], [1], [0, 0, 1, 1], [], []>} : vector<8x36xf32>, vector<36x256xf32>, vector<8x256xf32> -> vector<8x256xf32>
    %35 = vector.broadcast %31 : vector<8x1xf32> to vector<8x256xf32>
    %36 = arith.addf %34, %35 : vector<8x256xf32>
    %c0_19 = arith.constant 0 : index
    %c0_20 = arith.constant 0 : index
    %c0_21 = arith.constant 0 : index
    %37 = vector.load %arg4[%c0_19, %c0_20, %c0_21] : memref<2x8x256xf32, #tpu.memory_space<vmem>>, vector<1x8x256xf32>
    %38 = vector.shape_cast %37 : vector<1x8x256xf32> to vector<8x256xf32>
    %39 = vector.shape_cast %36 : vector<8x256xf32> to vector<1x8x256xf32>
    tpu.vector_store %arg4[%c0_19, %c0_20, %c0_21], %39 {strides = array<i32>} : memref<2x8x256xf32, #tpu.memory_space<vmem>>, vector<1x8x256xf32>,
    %c1 = arith.constant 1 : index
    %c0_22 = arith.constant 0 : index
    %c0_23 = arith.constant 0 : index
    %40 = vector.load %arg3[%c1, %c0_22, %c0_23] : memref<2x36x256xf32, #tpu.memory_space<vmem>>, vector<1x36x256xf32>
    %41 = vector.shape_cast %40 : vector<1x36x256xf32> to vector<36x256xf32>
    %cst_24 = arith.constant dense<0.000000e+00> : vector<8x256xf32>
    %42 = tpu.matmul %28, %41, %cst_24 {dimension_numbers = #tpu.dot_dimension_numbers<[1], [0], [0], [1], [0, 0, 1, 1], [], []>} : vector<8x36xf32>, vector<36x256xf32>, vector<8x256xf32> -> vector<8x256xf32>
    %43 = vector.broadcast %31 : vector<8x1xf32> to vector<8x256xf32>
    %44 = arith.addf %42, %43 : vector<8x256xf32>
    %c1_25 = arith.constant 1 : index
    %c0_26 = arith.constant 0 : index
    %c0_27 = arith.constant 0 : index
    %45 = vector.load %arg4[%c1_25, %c0_26, %c0_27] : memref<2x8x256xf32, #tpu.memory_space<vmem>>, vector<1x8x256xf32>
    %46 = vector.shape_cast %45 : vector<1x8x256xf32> to vector<8x256xf32>
    %47 = vector.shape_cast %44 : vector<8x256xf32> to vector<1x8x256xf32>
    tpu.vector_store %arg4[%c1_25, %c0_26, %c0_27], %47 {strides = array<i32>} : memref<2x8x256xf32, #tpu.memory_space<vmem>>, vector<1x8x256xf32>,
    return
  }
}

</mosaic_0001>

<bundles_post_ra>
// kernel: tpu_custom_call.1
= control target key start
LH: loop header
LB: loop body
LE: loop exit
PB: predicated region body
PF: predicated region fallthrough
CT: control target
= control target key end

     0   :  { %12 = vsyncpa [#allocation3], 0  ;;  %vm24_vm0 = vcmask 64512   ;;  %v513_v2 = vmov 0.0   ;;  %vm514_vm1 = vmmov 0   ;;  %s663_s0 = inlined_call_operand.vmem [shape: f32[8,36], index: 0, kind: input, shape index: {}]   ;;  %s664_s1 = inlined_call_operand.vmem [shape: f32[1,8], index: 1, kind: input, shape index: {}]   ;;  %s665_s2 = inlined_call_operand.vmem [shape: f32[8,1], index: 2, kind: input, shape index: {}]   ;;  %s666_s3 = inlined_call_operand.vmem [shape: f32[2,36,256], index: 3, kind: input, shape index: {}]   ;;  %s667_s4 = inlined_call_operand.hbm [shape: f32[2,8,256], index: 4, kind: output, shape index: {0}]   ;;  %s668_s5 = inlined_call_operand.vmem [shape: f32[8,1], index: 5, kind: output, shape index: {1}]   ;;  %s669_s6 = inlined_call_operand.hbm [shape: f32[8,36], index: 6, kind: output, shape index: {2}]  }
   0x1   :  { %v558_v0 = vld [vmem:[%s663_s0] sm:$0xff]  ;;  %416 = vmatprep.subr.mxu0 %v513_v2  ;;  %418 = vmatprep.mubr.msk.f32.mxu0 %vm514_vm1, %v513_v2 }
   0x2   :  { %v23_v1 = vld [vmem:[%s664_s1] sm:$0x1] }
   0x3   :  { %13 = vsyncpa [#allocation5], 0  ;;  %417 = vmatpush3.msra.mxu0 %v558_v0  ;;  %263 = vmatprep.mubr.f32.mxu1 %v513_v2  ;;  %vm99_vm2 = vcmask 286720   ;;  %v123_v21 = vlaneseq  ;;  %vm128_vm5 = vcmask 293888   ;;  %vm133_vm6 = vcmask 7168   ;;  %v175_v50 = vld [vmem:[%s666_s3 + $0x8] sm:$0xff] }
   0x4   :  { %419 = vmatmul.mubr.msk.f32.vlgmr.msra.gmra.mrb[0].mxu0 %vm24_vm0, %v23_v1  ;;  %v177_v51 = vld [vmem:[%s666_s3 + $0x18] sm:$0xff]  ;;  %v404_v54 = vld [vmem:[%s666_s3 + $0x68] sm:$0xff]  ;;  %v174_v55 = vld [vmem:[%s666_s3] sm:$0xff]  ;;  %vm192_vm9 = vcmask 1043456  }
   0x5   :  { %353 = vmatprep.mubr.f32.mxu0 %v513_v2  ;;  %v124_v22 = vshrl.u32 %v123_v21, 7  ;;  %v402_v52 = vld [vmem:[%s666_s3 + $0x58] sm:$0xff]  ;;  %v421_v53 = vpack.c.bf16 %v177_v51, %v175_v50  ;;  %v176_v56 = vld [vmem:[%s666_s3 + $0x10] sm:$0xff]  ;;  %v403_v60 = vld [vmem:[%s666_s3 + $0x60] sm:$0xff] }
   0x6   :  { %v429_v57 = vpack.c.bf16 %v404_v54, %v402_v52  ;;  %v423_v58 = vpack.c.bf16 %v176_v56, %v174_v55  ;;  %v401_v59 = vld [vmem:[%s666_s3 + $0x50] sm:$0xff]  ;;  %v179_v61 = vld [vmem:[%s666_s3 + $0x28] sm:$0xff]  ;;  %v181_v63 = vld [vmem:[%s666_s3 + $0x38] sm:$0xff] }
   0x7   :  { %v125_v23 = vsub.s32 0, %v124_v22  ;;  %422 = vmatprep.subr.bf16.mxu1 %v421_v53  ;;  %v431_v62 = vpack.c.bf16 %v403_v60, %v401_v59  ;;  %v406_v1 = vld [vmem:[%s666_s3 + $0x78] sm:$0xff]  ;;  %v408_v2 = vld [vmem:[%s666_s3 + $0x88] sm:$0xff] }
   0x8   :  { %430 = vmatprep.subr.bf16.mxu0 %v429_v57  ;;  %424 = vmatpush1.bf16.msra.mxu1 %v423_v58 }
   0x9   :  { %432 = vmatpush1.bf16.msra.mxu0 %v431_v62 }
  0xd7   :  { %v94_v3 = vpop.f32.mrb[0].mxu0 }
  0xd8   :  { %v420_v4 = vpop.f32.mrb[1].mxu0  ;;  %v98_v5 = vmul.f32 %v94_v3, %v94_v3 }
  0xd9   :  { %v433_v4 = vpack.c.bf16 %v408_v2, %v406_v1 }
  0xda   :  { %v100_v6 = vsel %vm99_vm2, %v98_v5, 0.0  ;;  %v178_v5 = vld [vmem:[%s666_s3 + $0x20] sm:$0xff] }
  0xdb   :  { %101 = vadd.xlane.f32.xlu0 %v100_v6  ;;  %v180_v6 = vld [vmem:[%s666_s3 + $0x30] sm:$0xff]  ;;  %434 = vmatprep.subr.bf16.mxu0 %v433_v4 }
 0x168   :  { %v102_v7 = vpop.xlane.xlu0 %101 }
 0x169   :  { %v103_v8 = vrot.slane %v102_v7, 4 }
 0x16b   :  { %v104_v9 = vadd.f32 %v103_v8, %v102_v7  ;;  %v405_v7 = vld [vmem:[%s666_s3 + $0x70] sm:$0xff]  ;;  %v427_v8 = vpack.c.bf16 %v180_v6, %v178_v5 }
 0x16d   :  { %v105_v10 = vrot.slane %v104_v9, 2 }
 0x16f   :  { %v106_v11 = vadd.f32 %v105_v10, %v104_v9  ;;  %v407_v9 = vld [vmem:[%s666_s3 + $0x80] sm:$0xff] }
 0x170   :  { %v435_v10 = vpack.c.bf16 %v407_v9, %v405_v7 }
 0x171   :  { %v107_v12 = vrot.slane %v106_v11, 1 }
 0x172   :  { %436 = vmatpush1.bf16.msra.mxu0 %v435_v10 }
 0x173   :  { %v108_v13 = vadd.f32 %v107_v12, %v106_v11  ;;  %v183_v11 = vld [vmem:[%s666_s3 + $0x48] sm:$0xf]  ;;  %v410_v12 = vld [vmem:[%s666_s3 + $0x98] sm:$0xf] }
 0x174   :  { %411 = vmatprep.subr.msk.mxu0 %vm192_vm9, %v410_v12 }
 0x175   :  { %437 = vpush %v108_v13  ;;  %v182_v13 = vld [vmem:[%s666_s3 + $0x40] sm:$0xf] }
 0x1a6   :  { %s438_s0 = spop %437 }
 0x1a7   :  { %v110_v14 = vstv %s438_s0 }
 0x1a8   :  { %455 = vrsqrt.f32 %v110_v14  ;;  %vm113_vm3 = vcmp.eq.f32.partialorder %v110_v14, inf  ;;  %v116_v17 = vand.u32 2147483648, %v110_v14  ;;  %vm115_vm4 = vcmp.eq.f32.partialorder %v110_v14, 0.0 }
 0x1b2   :  { %v456_v15 = vpop.eup %455 }
 0x1b3   :  { %v112_v16 = vmul.f32 %v456_v15, %v110_v14  ;;  %v173_v15 = vld [vmem:[%s665_s2] sm:$0xff]  ;;  %s516_s2 = smov [#allocation4]  }
 0x1b5   :  { %v114_v18 = vsel %vm113_vm3, %v110_v14, %v112_v16  ;;  %v409_v14 = vld [vmem:[%s666_s3 + $0x90] sm:$0xf]  ;;  %v515_v16 = vmov 0   ;;  %s383_s3 = sshll.u32 %s516_s2, 4  ;;  %s384_s3 = int_to_ptr.vmem [resolvable:$true] %s383_s3 }
 0x1b6   :  { %v117_v19 = vsel %vm115_vm4, %v116_v17, %v114_v18  ;;  %412 = vmatpush1.msk.msra.mxu0 %vm192_vm9, %v409_v14  ;;  %454 = vset.pattern.permute.xlu0 %v515_v16  ;;  %s465_s22 = scalar_lea.vmem %s384_s3, 128  ;;  %p470_p1 = scmp.lt.s32.totalorder %s384_s3, %s384_s3 }
 0x1b7   :  { %439 = vpush %v117_v19  ;;  %p466_p0 = scmp.ne.s32.totalorder %s384_s3, %s465_s22  ;;  %p471_p2 = scmp.lt.s32.totalorder %s465_s22, %s465_s22 }
 0x1b9   :  { %p472_p3 = por %p471_p2, %p470_p1 }
 0x1bb   :  { %p473_p4 = pnand %p472_p3, %p466_p0 }
 0x1e8   :  { %s440_s1 = spop %439 }
 0x1e9   :  { %s119_s25 = sadd.f32 1e-12, %s440_s1 }
 0x1eb   :  { %v120_v20 = vstv %s119_s25 }
 0x1ec   :  { %457 = vrcp.f32 %v120_v20 }
 0x1f6   :  { %v458_v24 = vpop.eup %457 }
 0x1f7   :  { %v122_v25 = vmul.f32 %v458_v24, %v94_v3  ;;  %v425_v3 = vpack.c.bf16 %v181_v63, %v179_v61 }
 0x1f9   :  { %v126_v26 = vrot.slane %v122_v25, %v125_v23  ;;  %426 = vmatprep.subr.bf16.mxu1 %v425_v3 }
 0x1fa   :  { %428 = vmatpush1.bf16.msra.mxu1 %v427_v8 }
 0x1fb   :  { %v127_v27 = vmul.f32 %v126_v26, %v558_v0  ;;  %398 = vmatprep.subr.msk.mxu1 %vm192_vm9, %v183_v11 }
 0x1fd   :  { %v129_v28 = vsel %vm128_vm5, %v127_v27, 0.0 }
 0x1fe   :  { %130 = vadd.xlane.f32.xlu0 %v129_v28  ;;  %399 = vmatpush1.msk.msra.mxu1 %vm192_vm9, %v182_v13 }
 0x214   :  { %186 = vperm.xlu0 %454, %v173_v15  }
 0x28b   :  { %v131_v29 = vpop.xlane.xlu0 %130 }
 0x28c   :  { %v132_v30 = vmul.f32 %v131_v29, %v131_v29 }
 0x28e   :  { %v134_v31 = vsel %vm133_vm6, %v132_v30, 0.0 }
 0x28f   :  { %135 = vadd.xlane.f32.xlu1 %v134_v31 }
 0x31c   :  { %v136_v32 = vpop.xlane.xlu1 %135 }
 0x31d   :  { %v137_v33 = vrot.slane %v136_v32, 4 }
 0x31f   :  { %v138_v34 = vadd.f32 %v137_v33, %v136_v32 }
 0x321   :  { %v139_v35 = vrot.slane %v138_v34, 2 }
 0x323   :  { %v140_v36 = vadd.f32 %v139_v35, %v138_v34 }
 0x325   :  { %v141_v37 = vrot.slane %v140_v36, 1 }
 0x327   :  { %v142_v38 = vadd.f32 %v141_v37, %v140_v36 }
 0x329   :  { %441 = vpush %v142_v38 }
 0x35a   :  { %s442_s26 = spop %441 }
 0x35b   :  { %v144_v39 = vstv %s442_s26 }
 0x35c   :  { %459 = vrsqrt.f32 %v144_v39  ;;  %vm147_vm7 = vcmp.eq.f32.partialorder %v144_v39, inf  ;;  %v150_v42 = vand.u32 2147483648, %v144_v39  ;;  %vm149_vm8 = vcmp.eq.f32.partialorder %v144_v39, 0.0 }
 0x366   :  { %v460_v40 = vpop.eup %459 }
 0x367   :  { %v146_v41 = vmul.f32 %v460_v40, %v144_v39 }
 0x369   :  { %v148_v43 = vsel %vm147_vm7, %v144_v39, %v146_v41 }
 0x36a   :  { %v151_v44 = vsel %vm149_vm8, %v150_v42, %v148_v43 }
 0x36b   :  { %443 = vpush %v151_v44 }
 0x39c   :  { %s444_s27 = spop %443 }
 0x39d   :  { %s153_s28 = sadd.f32 1e-12, %s444_s27 }
 0x39f   :  { %v154_v45 = vstv %s153_s28 }
 0x3a0   :  { %461 = vrcp.f32 %v154_v45 }
 0x3aa   :  { %v462_v46 = vpop.eup %461 }
 0x3ab   :  { %v156_v47 = vmul.f32 %v462_v46, %v131_v29 }
 0x3ad   :  { %v157_v48 = vmul.f32 %v156_v47, %v131_v29  ;;  %171 = vst.msk [vmem:[%s668_s5] sm:$0xff] %vm133_vm6, %v156_v47 }
 0x3af   :  { %v158_v49 = vsel %vm133_vm6, %v157_v48, 0.0 }
 0x3b0   :  { %159 = vadd.xlane.f32.xlu1 %v158_v49 }
 0x43d   :  { %v160_v17 = vpop.xlane.xlu1 %159 }
 0x43e   :  { %v161_v18 = vrot.slane %v160_v17, 4 }
 0x440   :  { %v162_v19 = vadd.f32 %v161_v18, %v160_v17 }
 0x442   :  { %v163_v20 = vrot.slane %v162_v19, 2 }
 0x444   :  { %v164_v21 = vadd.f32 %v163_v20, %v162_v19 }
 0x446   :  { %v165_v22 = vrot.slane %v164_v21, 1 }
 0x448   :  { %v166_v23 = vadd.f32 %v165_v22, %v164_v21 }
 0x44a   :  { %445 = vpush %v166_v23 }
 0x47b   :  { %s446_s21 = spop %445 }
 0x47c   :  { %v168_v24 = vstv %s446_s21 }
 0x47d   :  { %463 = vrcp.f32 %v168_v24 }
 0x487   :  { %v464_v25 = vpop.eup %463 }
 0x488   :  { %v170_v26 = vmul.f32 %v464_v25, %v558_v0 }
 0x48a   :  { %400 = vmatmul.mubr.msk.f32.vlgmr.msra.gmra.mrb[0].mxu1 %vm128_vm5, %v170_v26  ;;  %172 = vst.msk [vmem:[#allocation4] sm:$0xff] %vm128_vm5, %v170_v26  ;;  %413 = vmatmul.mubr.msk.f32.vlgmr.msra.gmra.mrb[2].mxu0 %vm128_vm5, %v170_v26 }
 0x48b   :  { %476 = shalt.err (!%p473_p4)
}
 0x48c   :  { %s477_s0 = scalar_lea.hbm %s669_s6, 128 }
 0x48d   :  { %p478_p5 = scmp.ne.s32.totalorder %s669_s6, %s477_s0  ;;  %p481_p6 = scmp.lt.u32.totalorder %s477_s0, %s669_s6 }
 0x48f   :  { %p483_p7 = pnand %p481_p6, %p478_p5 }
 0x491   :  { %486 = shalt.err (!%p483_p7)
}
 0x492   :  { %386 = dma.vmem_to_hbm [thread:$0]  %s384_s3, 128, %s669_s6, [#allocation5]   ;;  %v187_v0 = vpop.permute.xlu0 %186 }
 0x493   :  { %s517_s30 = smov [#allocation2]  }
 0x494   :  { %s368_s7 = sshll.u32 %s517_s30, 4  ;;  %s369_s7 = int_to_ptr.vmem [resolvable:$true] %s368_s7 }
 0x495   :  { %s487_s8 = scalar_lea.vmem %s369_s7, 512  ;;  %p492_p9 = scmp.lt.s32.totalorder %s369_s7, %s369_s7 }
 0x496   :  { %p488_p8 = scmp.ne.s32.totalorder %s369_s7, %s487_s8  ;;  %p493_p10 = scmp.lt.s32.totalorder %s487_s8, %s487_s8 }
 0x498   :  { %p494_p11 = por %p493_p10, %p492_p9 }
 0x49a   :  { %p495_p12 = pnand %p494_p11, %p488_p8 }
 0x55d   :  { %v265_v27 = vpop.f32.mrb[0].mxu1  ;;  %v355_v28 = vpop.f32.mrb[2].mxu0 }
 0x55e   :  { %v266_v29 = vadd.f32 %v265_v27, %v187_v0  ;;  %v356_v30 = vadd.f32 %v355_v28, %v187_v0  ;;  %v267_v31 = vpop.f32.mrb[1].mxu1  ;;  %v357_v32 = vpop.f32.mrb[3].mxu0 }
 0x55f   :  { %v268_v33 = vadd.f32 %v267_v31, %v187_v0  ;;  %v358_v34 = vadd.f32 %v357_v32, %v187_v0 }
 0x560   :  { %270 = vst [vmem:[#allocation2] sm:$0xff] %v266_v29  ;;  %361 = vst [vmem:[#allocation2 + $0x10] sm:$0xff] %v356_v30 }
 0x561   :  { %271 = vst [vmem:[#allocation2 + $0x8] sm:$0xff] %v268_v33  ;;  %362 = vst [vmem:[#allocation2 + $0x18] sm:$0xff] %v358_v34 }
 0x562   :  { %498 = shalt.err (!%p495_p12)
}
 0x563   :  { %s499_s10 = scalar_lea.hbm %s667_s4, 512 }
 0x564   :  { %p500_p13 = scmp.ne.s32.totalorder %s667_s4, %s499_s10  ;;  %p503_p0 = scmp.lt.u32.totalorder %s499_s10, %s667_s4 }
 0x566   :  { %p505_p1 = pnand %p503_p0, %p500_p13 }
 0x568   :  { %508 = shalt.err (!%p505_p1)
}
 0x569   :  { %s518_s5 = smov 256   ;;  %s519_s15 = smov 16  }
 0x56a   :  { %374 = dma.vmem_to_hbm [thread:$0]  %s369_s7, 512, %s667_s4, [#allocation3], %s518_s5, %s518_s5, %s519_s15  }
 0x56b   :  { %509 = dma.done.wait [#allocation3], 512  }
 0x56c   :  { %510 = vsyncadd [#allocation3], 4294966784 }
 0x56d   :  { %511 = dma.done.wait [#allocation5], 128  }
 0x56e   :  { %512 = vsyncadd [#allocation5], 4294967168 }
 0x56f   :  { %395 = vsyncpa [#allocation3], 1 }
 0x570   :  { %396 = vsyncpa [#allocation5], 1 }

</bundles_post_ra>
